<compile_context>
chip_gen: v5e
topology: v5e:2x2
jax: 0.10.0
libtpu: 0.0.40
codegen_flags: <defaults>
</compile_context>

<pallas_src>
import math

import jax
import jax.numpy as jnp
from jax.experimental import pallas as pl
from jax.experimental.pallas import tpu as pltpu


def _round_up(v, m):
    return ((v + m - 1) // m) * m


def _pad_feature_dim(d):
    # dims < 128: leave unpadded — a block whose last dim equals the full array
    # dim is legal, and for the tiny DETR head this avoids DMA'ing/multiplying
    # zeros (the review's biggest small-shape win).
    # dims >= 128: round up to a lane-dense multiple of 128 (unmasked vst).
    # TODO(synk): consider 256-alignment for very wide MXU-bound layers on
    # v6e/v7x; typical DETR dims (256) are already 256-aligned.
    return d if d < 128 else _round_up(d, 128)


def _vmem_capacity_bytes():
    try:
        return int(pltpu.get_tpu_info().vmem_capacity_bytes)
    except Exception:
        return 64 << 20  # conservative fallback: v7x per-TensorCore VMEM


# ---------------------------------------------------------------------------
# Fused MLP kernel: x -> [dot + bias (+ ReLU)] * num_layers -> out
# ---------------------------------------------------------------------------
def _make_mlp_kernel(num_layers, compute_dtype):
    def kernel(*refs):
        # refs layout: x_ref, (w0, b0, w1, b1, ...), o_ref
        x_ref = refs[0]
        o_ref = refs[1 + 2 * num_layers]
        h = x_ref[...]                                   # compute_dtype (bf16/f32) straight to the MXU
        acc = None
        for i in range(num_layers):
            w_ref = refs[1 + 2 * i]
            b_ref = refs[2 + 2 * i]
            acc = jnp.dot(h, w_ref[...], preferred_element_type=jnp.float32)
            acc = acc + b_ref[...]                       # bias add in f32 (bias stored f32)
            if i < num_layers - 1:
                acc = jnp.maximum(acc, 0.0)              # fused ReLU, f32
                h = acc.astype(compute_dtype)            # bf16 operand for next MXU pass
        o_ref[...] = acc.astype(o_ref.dtype)

    return kernel


# ---------------------------------------------------------------------------
# One-time parameter preparation (hoisted out of the forward pass)
# ---------------------------------------------------------------------------
def prepare_mlp_params(params, compute_dtype=jnp.bfloat16):
    """Pad + cast weights/biases once.

    params: list of (w, b) with w shaped (in_features, out_features)
            (transposed vs. PyTorch nn.Linear.weight).  Zero padding is exact:
            padded weight rows/cols and bias entries are zero and ReLU(0)=0.
    """
    dims = [params[0][0].shape[0]] + [w.shape[1] for (w, _) in params]
    dims_p = [_pad_feature_dim(d) for d in dims]
    layers = []
    for li, (w, b) in enumerate(params):
        k_in, k_out = w.shape
        w_p = jnp.pad(w, ((0, dims_p[li] - k_in), (0, dims_p[li + 1] - k_out)))
        b_p = jnp.pad(b, (0, dims_p[li + 1] - k_out))
        layers.append((w_p.astype(compute_dtype),
                       b_p.astype(jnp.float32).reshape(1, dims_p[li + 1])))
    return {
        "layers": layers,
        "in_dim": dims[0],
        "out_dim": dims[-1],
        "compute_dtype": compute_dtype,
    }


# ---------------------------------------------------------------------------
# Forward pass
# ---------------------------------------------------------------------------
def mlp_forward(prepared, x, *, tile_m_max=512):
    """x: (batch, queries, in_dim) -> (batch, queries, out_dim).

    ReLU after every layer except the last (matches the PyTorch module).
    """
    layers = prepared["layers"]
    in_dim = prepared["in_dim"]
    out_dim = prepared["out_dim"]
    compute_dtype = prepared["compute_dtype"]
    num_layers = len(layers)

    B, Q, D = x.shape
    assert D == in_dim, f"expected last dim {in_dim}, got {D}"
    M = B * Q
    d0_p = layers[0][0].shape[0]
    dims_p = [d0_p] + [w.shape[1] for (w, _) in layers]
    dL_p = dims_p[-1]

    # --- M tiling: multiples of 8 sublanes, capped at tile_m_max, and chosen
    #     so grid_m >= 2 whenever M allows (shards across both v7x TCs via the
    #     "parallel" annotation; extra ~0.35us step is a no-op on v5e/v6e). ---
    M8 = _round_up(M, 8)
    if M8 >= 16:
        tile_m = min(_round_up(tile_m_max, 8), _round_up(pl.cdiv(M8, 2), 8))
    else:
        tile_m = M8
    M_pad = _round_up(M8, tile_m)
    grid_m = M_pad // tile_m

    # --- input: cast to the MXU operand dtype; pad only as needed ------------
    x2d = x.reshape(M, D).astype(compute_dtype)
    if (M_pad, d0_p) != (M, D):
        x2d = jnp.pad(x2d, ((0, M_pad - M), (0, d0_p - D)))

    out_dtype = x.dtype
    c_isz = jnp.dtype(compute_dtype).itemsize
    o_isz = jnp.dtype(out_dtype).itemsize

    # --- generation-aware VMEM budget ----------------------------------------
    param_bytes = sum(w.size * c_isz + 8 * _round_up(b.shape[1], 128) * 4
                      for (w, b) in layers)
    act_bytes = tile_m * max(dims_p) * (4 + c_isz)           # live f32 acc + bf16 copy
    io_bytes = 2 * tile_m * (d0_p * c_isz + dL_p * o_isz)    # double-buffered x/out tiles
    resident = param_bytes + act_bytes + io_bytes
    vmem_cap = _vmem_capacity_bytes()
    if resident > int(0.85 * vmem_cap):
        # TODO(synk): add a weight-tiled fallback (extra "arbitrary" grid axis
        # over N/K with an f32 VMEM accumulator) for layers too wide to stay
        # VMEM-resident; an explicit error beats a silent clamp + spill.
        raise NotImplementedError(
            f"resident footprint {resident / 2**20:.1f} MiB exceeds VMEM budget "
            f"{0.85 * vmem_cap / 2**20:.1f} MiB; weight-tiled path not implemented")
    vmem_limit = min(int(0.9 * vmem_cap),
                     max(16 << 20, int(1.5 * resident) + (2 << 20)))

    # --- advisory cost estimate ------------------------------------------------
    flops = sum(2 * M_pad * w.shape[0] * w.shape[1] for (w, _) in layers)
    bytes_accessed = (x2d.size * c_isz + M_pad * dL_p * o_isz
                      + sum(w.size * c_isz + b.size * 4 for (w, b) in layers))
    cost = pl.CostEstimate(flops=int(flops), transcendentals=0,
                           bytes_accessed=int(bytes_accessed))

    def launch(single_buffer_params):
        param_kwargs = {}
        if single_buffer_params and hasattr(pl, "Buffered"):
            # Grid-invariant blocks: double-buffering buys nothing, so halve
            # their resident VMEM footprint.
            param_kwargs = {"pipeline_mode": pl.Buffered(1)}
        in_specs = [pl.BlockSpec((tile_m, d0_p), lambda i: (i, 0))]
        flat_args = [x2d]
        for (w, b) in layers:
            flat_args += [w, b]
            # Whole-array blocks with constant index_maps: weights/biases stay
            # VMEM-resident across every grid step.
            in_specs += [
                pl.BlockSpec(w.shape, lambda i: (0, 0), **param_kwargs),
                pl.BlockSpec(b.shape, lambda i: (0, 0), **param_kwargs),
            ]
        return pl.pallas_call(
            _make_mlp_kernel(num_layers, compute_dtype),
            out_shape=jax.ShapeDtypeStruct((M_pad, dL_p), out_dtype),
            grid=(grid_m,),
            in_specs=in_specs,
            out_specs=pl.BlockSpec((tile_m, dL_p), lambda i: (i, 0)),
            cost_estimate=cost,
            compiler_params=pltpu.CompilerParams(
                dimension_semantics=("parallel",),
                vmem_limit_bytes=vmem_limit,
            ),
        )(*flat_args)

    try:
        out2d = launch(True)
    except Exception:
        # pl.Buffered(1) not supported by this JAX/Mosaic version — fall back
        # to default (double-buffered) pipelining for the parameter blocks.
        out2d = launch(False)

    return out2d[:M, :out_dim].reshape(B, Q, out_dim)


# ---------------------------------------------------------------------------
# Parameter init (matches nn.Linear default: U(-1/sqrt(fan_in), 1/sqrt(fan_in)))
# ---------------------------------------------------------------------------
def init_mlp_params(key, in_dim, hidden_dim, out_dim, num_layers, dtype=jnp.float32):
    h = [hidden_dim] * (num_layers - 1)
    params = []
    for (n_in, n_out) in zip([in_dim] + h, h + [out_dim]):
        key, kw, kb = jax.random.split(key, 3)
        bound = 1.0 / math.sqrt(n_in)
        w = jax.random.uniform(kw, (n_in, n_out), dtype=dtype, minval=-bound, maxval=bound)
        b = jax.random.uniform(kb, (n_out,), dtype=dtype, minval=-bound, maxval=bound)
        params.append((w, b))
    return params


# Pure-JAX references for correctness checks.
def mlp_reference(params, x):
    """Exact f32 reference (matches the PyTorch module semantics)."""
    B, Q, D = x.shape
    h = x.reshape(B * Q, D)
    for i, (w, b) in enumerate(params):
        h = jnp.dot(h, w, precision=jax.lax.Precision.HIGHEST) + b
        if i < len(params) - 1:
            h = jnp.maximum(h, 0.0)
    return h.reshape(B, Q, -1)


def mlp_reference_bf16(params, x):
    """Emulates the kernel's bf16-operand / f32-accumulate numerics in plain JAX."""
    B, Q, D = x.shape
    h = x.reshape(B * Q, D).astype(jnp.bfloat16)
    for i, (w, b) in enumerate(params):
        acc = jnp.dot(h, w.astype(jnp.bfloat16),
                      preferred_element_type=jnp.float32) + b.astype(jnp.float32)
        if i < len(params) - 1:
            acc = jnp.maximum(acc, 0.0)
            h = acc.astype(jnp.bfloat16)
        else:
            h = acc
    return h.astype(x.dtype).reshape(B, Q, -1)


if __name__ == "__main__":
    # Small shapes consistent with DETR's MLP bbox head usage:
    # x: (batch, num_queries, in_dim)
    in_dim, hidden_dim, out_dim, num_layers = 4, 32, 4, 3
    batch, queries = 2, 8

    key = jax.random.PRNGKey(0)
    key, kx = jax.random.split(key)
    x = jax.random.normal(kx, (batch, queries, in_dim), dtype=jnp.float32)
    params = init_mlp_params(key, in_dim, hidden_dim, out_dim, num_layers)

    ref_f32 = mlp_reference(params, x)
    ref_bf16 = mlp_reference_bf16(params, x)

    # Default (performance) path: bf16 MXU operands, f32 accumulation.
    prep_bf16 = prepare_mlp_params(params, compute_dtype=jnp.bfloat16)
    out_bf16 = jax.block_until_ready(mlp_forward(prep_bf16, x))
    assert out_bf16.shape == (batch, queries, out_dim)
    # Tight structural check vs a bf16-emulating reference (same quantization).
    assert jnp.allclose(out_bf16, ref_bf16, atol=5e-3, rtol=5e-3), \
        "bf16 path mismatch vs bf16-emulating reference"
    # Loose semantic check vs the exact-f32 PyTorch semantics (bf16 rounding only).
    assert jnp.allclose(out_bf16, ref_f32, atol=1e-1, rtol=1e-1), \
        "bf16 path too far from f32 reference"

    # Optional exact-ish path: f32 operands everywhere (same kernel code).
    prep_f32 = prepare_mlp_params(params, compute_dtype=jnp.float32)
    out_f32 = jax.block_until_ready(mlp_forward(prep_f32, x))
    assert out_f32.shape == (batch, queries, out_dim)
    assert jnp.allclose(out_f32, ref_f32, atol=5e-2, rtol=5e-2), \
        "f32 path mismatch vs f32 reference"

    print("KERNEL_OK")
</pallas_src>

<mosaic_0001>
module attributes {stable_mosaic.version = 11 : i64} {
  func.func @kernel(%arg0: i32, %arg1: memref<8x4xbf16, #tpu.memory_space<vmem>>, %arg2: memref<4x32xbf16, #tpu.memory_space<vmem>>, %arg3: memref<1x32xf32, #tpu.memory_space<vmem>>, %arg4: memref<32x32xbf16, #tpu.memory_space<vmem>>, %arg5: memref<1x32xf32, #tpu.memory_space<vmem>>, %arg6: memref<32x4xbf16, #tpu.memory_space<vmem>>, %arg7: memref<1x4xf32, #tpu.memory_space<vmem>>, %arg8: memref<8x4xf32, #tpu.memory_space<vmem>>) attributes {dimension_semantics = [#tpu.dimension_semantics<parallel>], iteration_bounds = array<i64: 2>, scalar_prefetch = 0 : i64, scratch_operands = 0 : i64, tpu.core_type = #tpu.core_type<tc>, window_params = [{transform_indices = @transform_0, window_bounds = array<i64: 8, 4>}, {pipeline_mode = #tpu.pipeline_mode<synchronous>, transform_indices = @transform_1, window_bounds = array<i64: 4, 32>}, {pipeline_mode = #tpu.pipeline_mode<synchronous>, transform_indices = @transform_2, window_bounds = array<i64: 1, 32>}, {pipeline_mode = #tpu.pipeline_mode<synchronous>, transform_indices = @transform_3, window_bounds = array<i64: 32, 32>}, {pipeline_mode = #tpu.pipeline_mode<synchronous>, transform_indices = @transform_4, window_bounds = array<i64: 1, 32>}, {pipeline_mode = #tpu.pipeline_mode<synchronous>, transform_indices = @transform_5, window_bounds = array<i64: 32, 4>}, {pipeline_mode = #tpu.pipeline_mode<synchronous>, transform_indices = @transform_6, window_bounds = array<i64: 1, 4>}, {transform_indices = @transform_7, window_bounds = array<i64: 8, 4>}]} {
    %c0 = arith.constant 0 : index
    %c0_0 = arith.constant 0 : index
    %0 = vector.load %arg1[%c0, %c0_0] : memref<8x4xbf16, #tpu.memory_space<vmem>>, vector<8x4xbf16>
    %c0_1 = arith.constant 0 : index
    %c0_2 = arith.constant 0 : index
    %1 = vector.load %arg2[%c0_1, %c0_2] : memref<4x32xbf16, #tpu.memory_space<vmem>>, vector<4x32xbf16>
    %cst = arith.constant dense<0.000000e+00> : vector<8x32xf32>
    %2 = tpu.matmul %0, %1, %cst {dimension_numbers = #tpu.dot_dimension_numbers<[1], [0], [0], [1], [0, 0, 1, 1], [], []>} : vector<8x4xbf16>, vector<4x32xbf16>, vector<8x32xf32> -> vector<8x32xf32>
    %c0_3 = arith.constant 0 : index
    %c0_4 = arith.constant 0 : index
    %3 = vector.load %arg3[%c0_3, %c0_4] : memref<1x32xf32, #tpu.memory_space<vmem>>, vector<1x32xf32>
    %4 = vector.broadcast %3 : vector<1x32xf32> to vector<8x32xf32>
    %5 = arith.addf %2, %4 : vector<8x32xf32>
    %cst_5 = arith.constant 0.000000e+00 : f32
    %6 = vector.broadcast %cst_5 : f32 to vector<8x32xf32>
    %7 = arith.maximumf %5, %6 : vector<8x32xf32>
    %8 = arith.truncf %7 : vector<8x32xf32> to vector<8x32xbf16>
    %c0_6 = arith.constant 0 : index
    %c0_7 = arith.constant 0 : index
    %9 = vector.load %arg4[%c0_6, %c0_7] : memref<32x32xbf16, #tpu.memory_space<vmem>>, vector<32x32xbf16>
    %cst_8 = arith.constant dense<0.000000e+00> : vector<8x32xf32>
    %10 = tpu.matmul %8, %9, %cst_8 {dimension_numbers = #tpu.dot_dimension_numbers<[1], [0], [0], [1], [0, 0, 1, 1], [], []>} : vector<8x32xbf16>, vector<32x32xbf16>, vector<8x32xf32> -> vector<8x32xf32>
    %c0_9 = arith.constant 0 : index
    %c0_10 = arith.constant 0 : index
    %11 = vector.load %arg5[%c0_9, %c0_10] : memref<1x32xf32, #tpu.memory_space<vmem>>, vector<1x32xf32>
    %12 = vector.broadcast %11 : vector<1x32xf32> to vector<8x32xf32>
    %13 = arith.addf %10, %12 : vector<8x32xf32>
    %cst_11 = arith.constant 0.000000e+00 : f32
    %14 = vector.broadcast %cst_11 : f32 to vector<8x32xf32>
    %15 = arith.maximumf %13, %14 : vector<8x32xf32>
    %16 = arith.truncf %15 : vector<8x32xf32> to vector<8x32xbf16>
    %c0_12 = arith.constant 0 : index
    %c0_13 = arith.constant 0 : index
    %17 = vector.load %arg6[%c0_12, %c0_13] : memref<32x4xbf16, #tpu.memory_space<vmem>>, vector<32x4xbf16>
    %cst_14 = arith.constant dense<0.000000e+00> : vector<8x4xf32>
    %18 = tpu.matmul %16, %17, %cst_14 {dimension_numbers = #tpu.dot_dimension_numbers<[1], [0], [0], [1], [0, 0, 1, 1], [], []>} : vector<8x32xbf16>, vector<32x4xbf16>, vector<8x4xf32> -> vector<8x4xf32>
    %c0_15 = arith.constant 0 : index
    %c0_16 = arith.constant 0 : index
    %19 = vector.load %arg7[%c0_15, %c0_16] : memref<1x4xf32, #tpu.memory_space<vmem>>, vector<1x4xf32>
    %20 = vector.broadcast %19 : vector<1x4xf32> to vector<8x4xf32>
    %21 = arith.addf %18, %20 : vector<8x4xf32>
    %c0_17 = arith.constant 0 : index
    %c0_18 = arith.constant 0 : index
    %22 = vector.load %arg8[%c0_17, %c0_18] : memref<8x4xf32, #tpu.memory_space<vmem>>, vector<8x4xf32>
    tpu.vector_store %arg8[%c0_17, %c0_18], %21 {strides = array<i32>} : memref<8x4xf32, #tpu.memory_space<vmem>>, vector<8x4xf32>,
    return
  }
  func.func @transform_0(%arg0: i32) -> (i32, i32) {
    %c0_i32 = arith.constant 0 : i32
    %c0_i32_0 = arith.constant 0 : i32
    return %arg0, %c0_i32 : i32, i32
  }
  func.func @transform_1(%arg0: i32) -> (i32, i32) {
    %c0_i32 = arith.constant 0 : i32
    %c0_i32_0 = arith.constant 0 : i32
    %c0_i32_1 = arith.constant 0 : i32
    return %c0_i32, %c0_i32_0 : i32, i32
  }
  func.func @transform_2(%arg0: i32) -> (i32, i32) {
    %c0_i32 = arith.constant 0 : i32
    %c0_i32_0 = arith.constant 0 : i32
    %c0_i32_1 = arith.constant 0 : i32
    return %c0_i32, %c0_i32_0 : i32, i32
  }
  func.func @transform_3(%arg0: i32) -> (i32, i32) {
    %c0_i32 = arith.constant 0 : i32
    %c0_i32_0 = arith.constant 0 : i32
    %c0_i32_1 = arith.constant 0 : i32
    return %c0_i32, %c0_i32_0 : i32, i32
  }
  func.func @transform_4(%arg0: i32) -> (i32, i32) {
    %c0_i32 = arith.constant 0 : i32
    %c0_i32_0 = arith.constant 0 : i32
    %c0_i32_1 = arith.constant 0 : i32
    return %c0_i32, %c0_i32_0 : i32, i32
  }
  func.func @transform_5(%arg0: i32) -> (i32, i32) {
    %c0_i32 = arith.constant 0 : i32
    %c0_i32_0 = arith.constant 0 : i32
    %c0_i32_1 = arith.constant 0 : i32
    return %c0_i32, %c0_i32_0 : i32, i32
  }
  func.func @transform_6(%arg0: i32) -> (i32, i32) {
    %c0_i32 = arith.constant 0 : i32
    %c0_i32_0 = arith.constant 0 : i32
    %c0_i32_1 = arith.constant 0 : i32
    return %c0_i32, %c0_i32_0 : i32, i32
  }
  func.func @transform_7(%arg0: i32) -> (i32, i32) {
    %c0_i32 = arith.constant 0 : i32
    %c0_i32_0 = arith.constant 0 : i32
    return %arg0, %c0_i32 : i32, i32
  }
}

module attributes {stable_mosaic.version = 11 : i64} {
  func.func @kernel(%arg0: i32, %arg1: memref<8x4xbf16, #tpu.memory_space<vmem>>, %arg2: memref<4x32xbf16, #tpu.memory_space<vmem>>, %arg3: memref<1x32xf32, #tpu.memory_space<vmem>>, %arg4: memref<32x32xbf16, #tpu.memory_space<vmem>>, %arg5: memref<1x32xf32, #tpu.memory_space<vmem>>, %arg6: memref<32x4xbf16, #tpu.memory_space<vmem>>, %arg7: memref<1x4xf32, #tpu.memory_space<vmem>>, %arg8: memref<8x4xf32, #tpu.memory_space<vmem>>) attributes {dimension_semantics = [#tpu.dimension_semantics<parallel>], iteration_bounds = array<i64: 2>, scalar_prefetch = 0 : i64, scratch_operands = 0 : i64, tpu.core_type = #tpu.core_type<tc>, window_params = [{transform_indices = @transform_0, window_bounds = array<i64: 8, 4>}, {pipeline_mode = #tpu.pipeline_mode<synchronous>, transform_indices = @transform_1, window_bounds = array<i64: 4, 32>}, {pipeline_mode = #tpu.pipeline_mode<synchronous>, transform_indices = @transform_2, window_bounds = array<i64: 1, 32>}, {pipeline_mode = #tpu.pipeline_mode<synchronous>, transform_indices = @transform_3, window_bounds = array<i64: 32, 32>}, {pipeline_mode = #tpu.pipeline_mode<synchronous>, transform_indices = @transform_4, window_bounds = array<i64: 1, 32>}, {pipeline_mode = #tpu.pipeline_mode<synchronous>, transform_indices = @transform_5, window_bounds = array<i64: 32, 4>}, {pipeline_mode = #tpu.pipeline_mode<synchronous>, transform_indices = @transform_6, window_bounds = array<i64: 1, 4>}, {transform_indices = @transform_7, window_bounds = array<i64: 8, 4>}]} {
    %c0 = arith.constant 0 : index
    %c0_0 = arith.constant 0 : index
    %0 = vector.load %arg1[%c0, %c0_0] : memref<8x4xbf16, #tpu.memory_space<vmem>>, vector<8x4xbf16>
    %c0_1 = arith.constant 0 : index
    %c0_2 = arith.constant 0 : index
    %1 = vector.load %arg2[%c0_1, %c0_2] : memref<4x32xbf16, #tpu.memory_space<vmem>>, vector<4x32xbf16>
    %cst = arith.constant dense<0.000000e+00> : vector<8x32xf32>
    %2 = tpu.matmul %0, %1, %cst {dimension_numbers = #tpu.dot_dimension_numbers<[1], [0], [0], [1], [0, 0, 1, 1], [], []>} : vector<8x4xbf16>, vector<4x32xbf16>, vector<8x32xf32> -> vector<8x32xf32>
    %c0_3 = arith.constant 0 : index
    %c0_4 = arith.constant 0 : index
    %3 = vector.load %arg3[%c0_3, %c0_4] : memref<1x32xf32, #tpu.memory_space<vmem>>, vector<1x32xf32>
    %4 = vector.broadcast %3 : vector<1x32xf32> to vector<8x32xf32>
    %5 = arith.addf %2, %4 : vector<8x32xf32>
    %cst_5 = arith.constant 0.000000e+00 : f32
    %6 = vector.broadcast %cst_5 : f32 to vector<8x32xf32>
    %7 = arith.maximumf %5, %6 : vector<8x32xf32>
    %8 = arith.truncf %7 : vector<8x32xf32> to vector<8x32xbf16>
    %c0_6 = arith.constant 0 : index
    %c0_7 = arith.constant 0 : index
    %9 = vector.load %arg4[%c0_6, %c0_7] : memref<32x32xbf16, #tpu.memory_space<vmem>>, vector<32x32xbf16>
    %cst_8 = arith.constant dense<0.000000e+00> : vector<8x32xf32>
    %10 = tpu.matmul %8, %9, %cst_8 {dimension_numbers = #tpu.dot_dimension_numbers<[1], [0], [0], [1], [0, 0, 1, 1], [], []>} : vector<8x32xbf16>, vector<32x32xbf16>, vector<8x32xf32> -> vector<8x32xf32>
    %c0_9 = arith.constant 0 : index
    %c0_10 = arith.constant 0 : index
    %11 = vector.load %arg5[%c0_9, %c0_10] : memref<1x32xf32, #tpu.memory_space<vmem>>, vector<1x32xf32>
    %12 = vector.broadcast %11 : vector<1x32xf32> to vector<8x32xf32>
    %13 = arith.addf %10, %12 : vector<8x32xf32>
    %cst_11 = arith.constant 0.000000e+00 : f32
    %14 = vector.broadcast %cst_11 : f32 to vector<8x32xf32>
    %15 = arith.maximumf %13, %14 : vector<8x32xf32>
    %16 = arith.truncf %15 : vector<8x32xf32> to vector<8x32xbf16>
    %c0_12 = arith.constant 0 : index
    %c0_13 = arith.constant 0 : index
    %17 = vector.load %arg6[%c0_12, %c0_13] : memref<32x4xbf16, #tpu.memory_space<vmem>>, vector<32x4xbf16>
    %cst_14 = arith.constant dense<0.000000e+00> : vector<8x4xf32>
    %18 = tpu.matmul %16, %17, %cst_14 {dimension_numbers = #tpu.dot_dimension_numbers<[1], [0], [0], [1], [0, 0, 1, 1], [], []>} : vector<8x32xbf16>, vector<32x4xbf16>, vector<8x4xf32> -> vector<8x4xf32>
    %c0_15 = arith.constant 0 : index
    %c0_16 = arith.constant 0 : index
    %19 = vector.load %arg7[%c0_15, %c0_16] : memref<1x4xf32, #tpu.memory_space<vmem>>, vector<1x4xf32>
    %20 = vector.broadcast %19 : vector<1x4xf32> to vector<8x4xf32>
    %21 = arith.addf %18, %20 : vector<8x4xf32>
    %c0_17 = arith.constant 0 : index
    %c0_18 = arith.constant 0 : index
    %22 = vector.load %arg8[%c0_17, %c0_18] : memref<8x4xf32, #tpu.memory_space<vmem>>, vector<8x4xf32>
    tpu.vector_store %arg8[%c0_17, %c0_18], %21 {strides = array<i32>} : memref<8x4xf32, #tpu.memory_space<vmem>>, vector<8x4xf32>,
    return
  }
  func.func @transform_0(%arg0: i32) -> (i32, i32) {
    %c0_i32 = arith.constant 0 : i32
    %c0_i32_0 = arith.constant 0 : i32
    return %arg0, %c0_i32 : i32, i32
  }
  func.func @transform_1(%arg0: i32) -> (i32, i32) {
    %c0_i32 = arith.constant 0 : i32
    %c0_i32_0 = arith.constant 0 : i32
    %c0_i32_1 = arith.constant 0 : i32
    return %c0_i32, %c0_i32_0 : i32, i32
  }
  func.func @transform_2(%arg0: i32) -> (i32, i32) {
    %c0_i32 = arith.constant 0 : i32
    %c0_i32_0 = arith.constant 0 : i32
    %c0_i32_1 = arith.constant 0 : i32
    return %c0_i32, %c0_i32_0 : i32, i32
  }
  func.func @transform_3(%arg0: i32) -> (i32, i32) {
    %c0_i32 = arith.constant 0 : i32
    %c0_i32_0 = arith.constant 0 : i32
    %c0_i32_1 = arith.constant 0 : i32
    return %c0_i32, %c0_i32_0 : i32, i32
  }
  func.func @transform_4(%arg0: i32) -> (i32, i32) {
    %c0_i32 = arith.constant 0 : i32
    %c0_i32_0 = arith.constant 0 : i32
    %c0_i32_1 = arith.constant 0 : i32
    return %c0_i32, %c0_i32_0 : i32, i32
  }
  func.func @transform_5(%arg0: i32) -> (i32, i32) {
    %c0_i32 = arith.constant 0 : i32
    %c0_i32_0 = arith.constant 0 : i32
    %c0_i32_1 = arith.constant 0 : i32
    return %c0_i32, %c0_i32_0 : i32, i32
  }
  func.func @transform_6(%arg0: i32) -> (i32, i32) {
    %c0_i32 = arith.constant 0 : i32
    %c0_i32_0 = arith.constant 0 : i32
    %c0_i32_1 = arith.constant 0 : i32
    return %c0_i32, %c0_i32_0 : i32, i32
  }
  func.func @transform_7(%arg0: i32) -> (i32, i32) {
    %c0_i32 = arith.constant 0 : i32
    %c0_i32_0 = arith.constant 0 : i32
    return %arg0, %c0_i32 : i32, i32
  }
}

</mosaic_0001>

<bundles_post_ra>
// kernel: tpu_custom_call.1
= control target key start
LH: loop header
LB: loop body
LE: loop exit
PB: predicated region body
PF: predicated region fallthrough
CT: control target
= control target key end

     0   :  { %s524_s24 = smov 0   ;;  %s571_s0 = inlined_call_operand.vmem [shape: bf16[16,4], index: 0, kind: input, shape index: {}]   ;;  %s572_s1 = inlined_call_operand.vmem [shape: bf16[4,32], index: 1, kind: input, shape index: {}]   ;;  %s573_s2 = inlined_call_operand.vmem [shape: f32[1,32], index: 2, kind: input, shape index: {}]   ;;  %s574_s3 = inlined_call_operand.vmem [shape: bf16[32,32], index: 3, kind: input, shape index: {}]   ;;  %s575_s4 = inlined_call_operand.vmem [shape: f32[1,32], index: 4, kind: input, shape index: {}]   ;;  %s576_s5 = inlined_call_operand.vmem [shape: bf16[32,4], index: 5, kind: input, shape index: {}]   ;;  %s577_s6 = inlined_call_operand.vmem [shape: f32[1,4], index: 6, kind: input, shape index: {}]   ;;  %s578_s7 = inlined_call_operand.vmem [shape: f32[16,4], index: 7, kind: output, shape index: {}]  }
   0x1 LB: > { %s433_s25 = sadd.s32 4294967295, %s482_s24   ;;  %p437_p0 = scmp.ge.s32.totalorder %s482_s24, 1  ;;  %s482_s24 = sphi %s524_s24, %s17_s24  }
   0x2   : > { %p236_p1 = scmp.lt.s32.totalorder %s482_s24, 3 }
   0x4   : > { %p237_p2 = pnand %p437_p0, %p236_p1 }
   0x5   : > { %p266_p3 = scmp.lt.s32.totalorder (!%p237_p2), %s433_s25, 1 }
   0x6   : > { %240 = sbr.rel (%p237_p2) target bundleno = 420 (0x1a4), region = 48 }
   0xb   : > { %v276_v0 = vld [vmem:[%s572_s1] sm:$0x3]  ;;  %vm285_vm0 = vcmask 1041408   ;;  %s580_s25 = smov (!%p266_p3, %s433_s25), 1  ;;  %vm281_vm1 = vcmask 31744   ;;  %v462_v3 = vld [vmem:[%s574_s3 + $0x8] sm:$0xff] }
   0xc   : > { %v287_v1 = vsel %vm285_vm0, %v276_v0, 0  ;;  %s438_s28 = sshll.u32 %s580_s25, 2  ;;  %334 = vmatpush.bf16.msra.mxu1 %v462_v3  ;;  %v461_v4 = vld [vmem:[%s574_s3] sm:$0xff]  ;;  %vm324_vm2 = vcmask 261120   ;;  %v464_v11 = vld [vmem:[%s576_s5 + $0x8] sm:$0xff]  ;;  %s439_s21 = sshll.u32 %s580_s25, 3 }
   0xd   : > { %296 = vmatpush.bf16.msra.mxu0 %v287_v1  ;;  %s269_s8 = scalar_lea.vmem %s571_s0, %s438_s28  ;;  %v473_v5 = vld [vmem:[%s573_s2] ss:$0 sm:$0xff]  ;;  %372 = vmatpush.bf16.msra.mxu2 %v464_v11  ;;  %s273_s28 = scalar_lea.vmem %s578_s7, %s439_s21 }
   0xe   : > { %v275_v2 = vld [vmem:[%s269_s8] sm:$0xf] }
   0xf   : > { %v463_v12 = vld [vmem:[%s576_s5] sm:$0xff] }
  0x10   : > { %440 = vmatmul.msk.bf16.vlgmr.msra.gmra.mxu0 %vm281_vm1, %v275_v2  ;;  %335 = vmatpush.bf16.msra.mxu1 %v461_v4  ;;  %v474_v13 = vld [vmem:[%s575_s4] ss:$0 sm:$0xff] }
  0x11   : > { %373 = vmatpush.bf16.msra.mxu2 %v463_v12  ;;  %v475_v19 = vld [vmem:[%s577_s6] ss:$0 sm:$0xff] }
  0x8d   : > { %v298_v6 = vpop.f32.mrf.mxu0 }
  0x8e   : > { %v299_v7 = vadd.f32 %v473_v5, %v298_v6 }
  0x90   : > { %v302_v8 = vmax.f32 %v299_v7, 0.0 }
  0x92   : > { %v303_v9 = vpack.c.bf16 %v302_v8, %v302_v8 }
  0x94   : > { %449 = vmatmul.msk.bf16.vlgmr.msra.gmra.mxu1 %vm324_vm2, %v303_v9 }
  0x95   : > { %v300_v10 = vpop.f32.mrf.mxu0 }
 0x111   : > { %v337_v14 = vpop.f32.mrf.mxu1 }
 0x112   : > { %v338_v15 = vadd.f32 %v474_v13, %v337_v14 }
 0x114   : > { %v341_v16 = vmax.f32 %v338_v15, 0.0 }
 0x116   : > { %v342_v17 = vpack.c.bf16 %v341_v16, %v341_v16 }
 0x118   : > { %458 = vmatmul.msk.bf16.vlgmr.msra.gmra.mxu2 %vm324_vm2, %v342_v17 }
 0x119   : > { %v339_v18 = vpop.f32.mrf.mxu1 }
 0x19b   : > { %v375_v20 = vpop.f32.mrf.mxu2 }
 0x19c   : > { %v376_v21 = vadd.f32 %v475_v19, %v375_v20 }
 0x19e   : > { %379 = vst.msk [vmem:[%s273_s28] sm:$0xff] %vm281_vm1, %v376_v21 }
 0x1a3   : > { %v377_v22 = vpop.f32.mrf.mxu2 }
 0x1a4 PF: > { %s17_s24 = sadd.s32 1, %s482_s24  }
 0x1a5   : > { %p14_p4 = scmp.ge.s32.totalorder %s17_s24, 4  }
 0x1a7   :  { %16 = sbr.rel (!%p14_p4) target bundleno = 1 (0x1), region = 78 }

// kernel: tpu_custom_call.1
= control target key start
LH: loop header
LB: loop body
LE: loop exit
PB: predicated region body
PF: predicated region fallthrough
CT: control target
= control target key end

     0   :  { %s524_s24 = smov 0   ;;  %s571_s0 = inlined_call_operand.vmem [shape: bf16[16,4], index: 0, kind: input, shape index: {}]   ;;  %s572_s1 = inlined_call_operand.vmem [shape: bf16[4,32], index: 1, kind: input, shape index: {}]   ;;  %s573_s2 = inlined_call_operand.vmem [shape: f32[1,32], index: 2, kind: input, shape index: {}]   ;;  %s574_s3 = inlined_call_operand.vmem [shape: bf16[32,32], index: 3, kind: input, shape index: {}]   ;;  %s575_s4 = inlined_call_operand.vmem [shape: f32[1,32], index: 4, kind: input, shape index: {}]   ;;  %s576_s5 = inlined_call_operand.vmem [shape: bf16[32,4], index: 5, kind: input, shape index: {}]   ;;  %s577_s6 = inlined_call_operand.vmem [shape: f32[1,4], index: 6, kind: input, shape index: {}]   ;;  %s578_s7 = inlined_call_operand.vmem [shape: f32[16,4], index: 7, kind: output, shape index: {}]  }
   0x1 LB: > { %s433_s25 = sadd.s32 4294967295, %s482_s24   ;;  %p437_p0 = scmp.ge.s32.totalorder %s482_s24, 1  ;;  %s482_s24 = sphi %s524_s24, %s17_s24  }
   0x2   : > { %p236_p1 = scmp.lt.s32.totalorder %s482_s24, 3 }
   0x4   : > { %p237_p2 = pnand %p437_p0, %p236_p1 }
   0x5   : > { %p266_p3 = scmp.lt.s32.totalorder (!%p237_p2), %s433_s25, 1 }
   0x6   : > { %240 = sbr.rel (%p237_p2) target bundleno = 420 (0x1a4), region = 48 }
   0xb   : > { %v276_v0 = vld [vmem:[%s572_s1] sm:$0x3]  ;;  %vm285_vm0 = vcmask 1041408   ;;  %s580_s25 = smov (!%p266_p3, %s433_s25), 1  ;;  %vm281_vm1 = vcmask 31744   ;;  %v462_v3 = vld [vmem:[%s574_s3 + $0x8] sm:$0xff] }
   0xc   : > { %v287_v1 = vsel %vm285_vm0, %v276_v0, 0  ;;  %s438_s28 = sshll.u32 %s580_s25, 2  ;;  %334 = vmatpush.bf16.msra.mxu1 %v462_v3  ;;  %v461_v4 = vld [vmem:[%s574_s3] sm:$0xff]  ;;  %vm324_vm2 = vcmask 261120   ;;  %v464_v11 = vld [vmem:[%s576_s5 + $0x8] sm:$0xff]  ;;  %s439_s21 = sshll.u32 %s580_s25, 3 }
   0xd   : > { %296 = vmatpush.bf16.msra.mxu0 %v287_v1  ;;  %s269_s8 = scalar_lea.vmem %s571_s0, %s438_s28  ;;  %v473_v5 = vld [vmem:[%s573_s2] ss:$0 sm:$0xff]  ;;  %372 = vmatpush.bf16.msra.mxu2 %v464_v11  ;;  %s273_s28 = scalar_lea.vmem %s578_s7, %s439_s21 }
   0xe   : > { %v275_v2 = vld [vmem:[%s269_s8] sm:$0xf] }
   0xf   : > { %v463_v12 = vld [vmem:[%s576_s5] sm:$0xff] }
  0x10   : > { %440 = vmatmul.msk.bf16.vlgmr.msra.gmra.mxu0 %vm281_vm1, %v275_v2  ;;  %335 = vmatpush.bf16.msra.mxu1 %v461_v4  ;;  %v474_v13 = vld [vmem:[%s575_s4] ss:$0 sm:$0xff] }
  0x11   : > { %373 = vmatpush.bf16.msra.mxu2 %v463_v12  ;;  %v475_v19 = vld [vmem:[%s577_s6] ss:$0 sm:$0xff] }
  0x8d   : > { %v298_v6 = vpop.f32.mrf.mxu0 }
  0x8e   : > { %v299_v7 = vadd.f32 %v473_v5, %v298_v6 }
  0x90   : > { %v302_v8 = vmax.f32 %v299_v7, 0.0 }
  0x92   : > { %v303_v9 = vpack.c.bf16 %v302_v8, %v302_v8 }
  0x94   : > { %449 = vmatmul.msk.bf16.vlgmr.msra.gmra.mxu1 %vm324_vm2, %v303_v9 }
  0x95   : > { %v300_v10 = vpop.f32.mrf.mxu0 }
 0x111   : > { %v337_v14 = vpop.f32.mrf.mxu1 }
 0x112   : > { %v338_v15 = vadd.f32 %v474_v13, %v337_v14 }
 0x114   : > { %v341_v16 = vmax.f32 %v338_v15, 0.0 }
 0x116   : > { %v342_v17 = vpack.c.bf16 %v341_v16, %v341_v16 }
 0x118   : > { %458 = vmatmul.msk.bf16.vlgmr.msra.gmra.mxu2 %vm324_vm2, %v342_v17 }
 0x119   : > { %v339_v18 = vpop.f32.mrf.mxu1 }
 0x19b   : > { %v375_v20 = vpop.f32.mrf.mxu2 }
 0x19c   : > { %v376_v21 = vadd.f32 %v475_v19, %v375_v20 }
 0x19e   : > { %379 = vst.msk [vmem:[%s273_s28] sm:$0xff] %vm281_vm1, %v376_v21 }
 0x1a3   : > { %v377_v22 = vpop.f32.mrf.mxu2 }
 0x1a4 PF: > { %s17_s24 = sadd.s32 1, %s482_s24  }
 0x1a5   : > { %p14_p4 = scmp.ge.s32.totalorder %s17_s24, 4  }
 0x1a7   :  { %16 = sbr.rel (!%p14_p4) target bundleno = 1 (0x1), region = 78 }

</bundles_post_ra>
